<compile_context>
chip_gen: v7x
topology: tpu7x:2x2x1
jax: 0.10.0
libtpu: 0.0.40
codegen_flags: <defaults>
</compile_context>

<pallas_src>
import functools

import jax
import jax.numpy as jnp
from jax.experimental import pallas as pl
from jax.experimental.pallas import tpu as pltpu


# ----------------------------- helpers --------------------------------------

def _round_up(x, m):
    return ((x + m - 1) // m) * m


def _cdiv(a, b):
    return (a + b - 1) // b


def _largest_mult128_divisor(total, cap):
    """Largest multiple of 128 that divides `total` (itself a multiple of 128)
    and is <= cap. Always >= 128."""
    q = total // 128
    best = 1
    for d in range(1, q + 1):
        if q % d == 0 and 128 * d <= cap:
            best = d
    return 128 * best


def _vmem_capacity_bytes():
    """Physical VMEM per core for the current generation (128 MiB on v5e/v6e,
    64 MiB on v7x); conservative fallback if the query is unavailable."""
    try:
        info = pltpu.get_tpu_info()
        cap = int(getattr(info, "vmem_capacity_bytes", 0) or 0)
        if cap > 0:
            return cap
    except Exception:
        pass
    return 64 * 1024 * 1024


def _choose_tiles_2d(M, K, Np, x_bytes, w_bytes, out_bytes, budget, sub):
    """Weight-resident (no K tiling) tile choice.  Prefer a single M tile so
    the weight is DMA'd exactly once; shrink tn before tm.  Returns None if
    even the minimal 2-D tiling does not fit the budget."""
    tm = _round_up(M, sub)
    tn = Np

    def fp(tm_, tn_):
        m_blocks = _cdiv(M, tm_)
        n_blocks = Np // tn_
        xb = 1 if m_blocks == 1 else 2       # Buffered(1) when index constant
        wb = 1 if n_blocks == 1 else 2
        return (xb * tm_ * K * x_bytes        # x block
                + wb * K * tn_ * w_bytes      # weight block
                + wb * 8 * tn_ * 4            # bias block (sublane padded)
                + 2 * tm_ * tn_ * out_bytes)  # output block (double buffered)

    while fp(tm, tn) > budget:
        x_only = (1 if _cdiv(M, tm) == 1 else 2) * tm * K * x_bytes
        if tn > 128 and x_only <= budget // 2:
            tn = _largest_mult128_divisor(Np, tn // 2)
        elif tm > sub:
            tm = max(sub, _round_up(tm // 2, sub))
        elif tn > 128:
            tn = _largest_mult128_divisor(Np, tn // 2)
        else:
            return None

    # If the whole problem would be one grid block, split N in two so a chip
    # with two TensorCores (v7x) gets one parallel block per core.  The total
    # weight traffic stays 1x (each core reads half of W^T); only the tiny x
    # block is shared.  On 1-TC chips this just adds ~one grid step.
    if _cdiv(M, tm) == 1 and Np // tn == 1 and Np >= 256:
        tn = _largest_mult128_divisor(Np, Np // 2)

    return tm, tn, fp(tm, tn)


def _choose_tiles_3d(M, Kp, Np, x_bytes, w_bytes, out_bytes, budget, sub):
    """Last-resort tiling with a K grid axis (weights too large to be
    VMEM-resident).  Shrink tk first (K tiling adds no HBM traffic), then tn,
    then tm (M splits re-read the whole weight)."""
    tm = min(1024, _round_up(M, sub))
    tk = Kp
    tn = Np

    def fp(tm_, tk_, tn_):
        return (2 * tm_ * tk_ * x_bytes + 2 * tk_ * tn_ * w_bytes
                + 2 * 8 * tn_ * 4 + 2 * tm_ * tn_ * out_bytes
                + tm_ * tn_ * 4)              # f32 accumulator scratch

    while fp(tm, tk, tn) > budget:
        if tk > 128:
            tk = _largest_mult128_divisor(Kp, tk // 2)
        elif tn > 128:
            tn = _largest_mult128_divisor(Np, tn // 2)
        elif tm > sub:
            tm = max(sub, _round_up(tm // 2, sub))
        else:
            break
    return tm, tk, tn, fp(tm, tk, tn)


# ----------------------------- kernels ---------------------------------------

def _head_kernel_resident(x_ref, w_ref, b_ref, o_ref, *, compute_dtype):
    # Whole-K block: one MXU matmul with f32 accumulation and fused bias.
    # No accumulator scratch, no pl.when branches, no K grid axis.
    x = x_ref[...].astype(compute_dtype)          # per-block cast (no-op for f32)
    acc = jnp.dot(x, w_ref[...], preferred_element_type=jnp.float32)
    o_ref[...] = (acc + b_ref[...]).astype(o_ref.dtype)


def _head_kernel_ktiled(x_ref, w_ref, b_ref, o_ref, acc_ref, *, compute_dtype):
    # Fallback path: K is tiled, accumulate in f32 scratch.
    @pl.when(pl.program_id(2) == 0)
    def _():
        acc_ref[...] = jnp.zeros_like(acc_ref)

    acc_ref[...] += jnp.dot(x_ref[...].astype(compute_dtype), w_ref[...],
                            preferred_element_type=jnp.float32)

    @pl.when(pl.program_id(2) == pl.num_programs(2) - 1)
    def _():
        o_ref[...] = (acc_ref[...] + b_ref[...]).astype(o_ref.dtype)


# ----------------------------- wrapper ----------------------------------------

def prepare_head_params(weight, bias, *, compute_dtype=jnp.bfloat16):
    """One-time parameter prep (call at load time, not per forward):
      weight: [target_window, nf]   (PyTorch nn.Linear layout)
      bias:   [target_window]
    Returns (w_t, b_pad):
      w_t:   [nf, N_pad]  = W^T cast to compute_dtype, N zero-padded to 128x
      b_pad: [1,  N_pad]  f32 bias, zero-padded
    K (=nf) is intentionally left unpadded: the weight-resident kernel uses a
    full-extent K block, so no per-call K padding of x is needed."""
    target_window, nf = weight.shape
    n_pad = _round_up(target_window, 128)
    w_t = jnp.pad(weight.T.astype(compute_dtype),
                  ((0, 0), (0, n_pad - target_window)))
    b_pad = jnp.pad(bias.astype(jnp.float32),
                    (0, n_pad - target_window)).reshape(1, n_pad)
    return w_t, b_pad


def flatten_head_forward(x, w_t, b_pad, target_window, *,
                         compute_dtype=None, out_dtype=None):
    """x: [bs, n_vars, d_model, patch_num]; (w_t, b_pad) from prepare_head_params.
    Returns [bs, n_vars, target_window] in out_dtype (default x.dtype).
    Dropout(head_dropout) is the identity at inference."""
    bs, n_vars, d_model, patch_num = x.shape
    nf = d_model * patch_num
    Kw, Np = w_t.shape
    assert Kw == nf and Np >= target_window
    M = bs * n_vars
    if compute_dtype is None:
        compute_dtype = w_t.dtype
    if out_dtype is None:
        out_dtype = x.dtype

    # Glue (plain JAX): Flatten(start_dim=-2) + collapse leading dims.
    # No cast and (usually) no padding here -> no extra HBM pass over x.
    x2d = x.reshape(M, nf)

    x_bytes = jnp.dtype(x.dtype).itemsize
    w_bytes = jnp.dtype(w_t.dtype).itemsize
    out_bytes = jnp.dtype(out_dtype).itemsize
    sub = 16 if x_bytes == 2 else 8            # 16-row tiles for packed bf16 x

    cap = _vmem_capacity_bytes()
    budget = int(0.6 * cap)

    cost = pl.CostEstimate(
        flops=2 * M * nf * Np,
        transcendentals=0,
        bytes_accessed=(M * nf * x_bytes + nf * Np * w_bytes + Np * 4
                        + M * Np * out_bytes),
    )

    tiles = _choose_tiles_2d(M, nf, Np, x_bytes, w_bytes, out_bytes, budget, sub)

    if tiles is not None:
        # ---- fast path: weight-resident, 2-D grid, no accumulator scratch ----
        tm, tn, fp = tiles
        Mp = _round_up(M, tm)
        if Mp != M:
            x2d = jnp.pad(x2d, ((0, Mp - M), (0, 0)))
        m_blocks, n_blocks = Mp // tm, Np // tn
        grid = (m_blocks, n_blocks)
        kern = functools.partial(_head_kernel_resident, compute_dtype=compute_dtype)
        vmem_limit = int(min(cap * 3 // 4,
                             max(32 * 1024 * 1024, fp + 8 * 1024 * 1024)))

        def run(use_buffered):
            def spec(shape, idx, const):
                if use_buffered and const:
                    # Grid-invariant block: single buffer instead of double.
                    return pl.BlockSpec(shape, idx, pipeline_mode=pl.Buffered(1))
                return pl.BlockSpec(shape, idx)

            in_specs = [
                spec((tm, nf), lambda i, j: (i, 0), m_blocks == 1),   # x slab
                spec((nf, tn), lambda i, j: (0, j), n_blocks == 1),   # W^T
                spec((1, tn), lambda i, j: (0, j), n_blocks == 1),    # bias
            ]
            return pl.pallas_call(
                kern,
                out_shape=jax.ShapeDtypeStruct((Mp, Np), out_dtype),
                grid_spec=pltpu.PrefetchScalarGridSpec(
                    num_scalar_prefetch=0,
                    grid=grid,
                    in_specs=in_specs,
                    out_specs=pl.BlockSpec((tm, tn), lambda i, j: (i, j)),
                ),
                compiler_params=pltpu.CompilerParams(
                    dimension_semantics=("parallel", "parallel"),
                    vmem_limit_bytes=vmem_limit,
                ),
                cost_estimate=cost,
            )(x2d, w_t, b_pad)

        if m_blocks == 1 or n_blocks == 1:
            try:
                out2d = run(True)        # single-buffer grid-invariant blocks
            except Exception:
                out2d = run(False)       # fall back if Buffered(1) unsupported
        else:
            out2d = run(False)
    else:
        # ---- fallback: K-tiled 3-D grid with f32 accumulator (huge weights) ----
        # Both x and the weight are zero-padded along K so the padding is inert.
        Kp = _round_up(nf, 128)
        tm, tk, tn, fp = _choose_tiles_3d(M, Kp, Np, x_bytes, w_bytes,
                                          out_bytes, budget, sub)
        Mp = _round_up(M, tm)
        x2d = jnp.pad(x2d, ((0, Mp - M), (0, Kp - nf)))
        w_p = jnp.pad(w_t, ((0, Kp - nf), (0, 0)))
        grid = (Mp // tm, Np // tn, Kp // tk)
        kern = functools.partial(_head_kernel_ktiled, compute_dtype=compute_dtype)
        vmem_limit = int(min(cap * 3 // 4,
                             max(32 * 1024 * 1024, fp + 8 * 1024 * 1024)))
        out2d = pl.pallas_call(
            kern,
            out_shape=jax.ShapeDtypeStruct((Mp, Np), out_dtype),
            grid_spec=pltpu.PrefetchScalarGridSpec(
                num_scalar_prefetch=0,
                grid=grid,
                in_specs=[
                    pl.BlockSpec((tm, tk), lambda i, j, k: (i, k)),
                    pl.BlockSpec((tk, tn), lambda i, j, k: (k, j)),
                    pl.BlockSpec((1, tn), lambda i, j, k: (0, j)),
                ],
                out_specs=pl.BlockSpec((tm, tn), lambda i, j, k: (i, j)),
                scratch_shapes=[pltpu.VMEM((tm, tn), jnp.float32)],
            ),
            compiler_params=pltpu.CompilerParams(
                dimension_semantics=("parallel", "parallel", "arbitrary"),
                vmem_limit_bytes=vmem_limit,
            ),
            cost_estimate=cost,
        )(x2d, w_p, b_pad)

    # Dropout(head_dropout) is the identity at inference; nothing to do.
    return out2d[:M, :target_window].reshape(bs, n_vars, target_window)


def flatten_head_reference(x, weight, bias):
    bs, n_vars, d_model, patch_num = x.shape
    x2 = x.reshape(bs, n_vars, d_model * patch_num)
    return jnp.einsum("bvk,tk->bvt", x2, weight,
                      precision=jax.lax.Precision.HIGHEST) + bias


# ----------------------------- self-test --------------------------------------

if __name__ == "__main__":
    key = jax.random.PRNGKey(0)
    bs, n_vars, d_model, patch_num = 2, 4, 16, 16
    nf = d_model * patch_num                 # 256
    target_window = 32

    kx, kw, kb = jax.random.split(key, 3)
    x = jax.random.normal(kx, (bs, n_vars, d_model, patch_num), dtype=jnp.float32)
    # Deterministic nn.Linear-style params (synthetic, not a checkpoint).
    bound = 1.0 / (nf ** 0.5)
    weight = jax.random.uniform(kw, (target_window, nf), jnp.float32, -bound, bound)
    bias = jax.random.uniform(kb, (target_window,), jnp.float32, -bound, bound)

    ref = flatten_head_reference(x, weight, bias)

    # f32 compute path: exact check against the reference.
    w_t32, b32 = prepare_head_params(weight, bias, compute_dtype=jnp.float32)
    out32 = jax.block_until_ready(flatten_head_forward(x, w_t32, b32, target_window))
    assert out32.shape == (bs, n_vars, target_window)
    assert jnp.allclose(out32, ref, atol=1e-4, rtol=1e-4)

    # bf16 operands / f32 accumulate: default fast (memory-bound) path.
    # NOTE: deliberate precision reduction vs PyTorch's f32 Linear.
    w_tbf, bbf = prepare_head_params(weight, bias)   # bf16 weights, done once
    outbf = jax.block_until_ready(flatten_head_forward(x, w_tbf, bbf, target_window))
    assert outbf.shape == (bs, n_vars, target_window)
    assert jnp.allclose(outbf.astype(jnp.float32), ref, atol=5e-2, rtol=5e-2)

    print("KERNEL_OK")
</pallas_src>

<mosaic_0001>
module attributes {stable_mosaic.version = 11 : i64} {
  func.func @_head_kernel_resident(%arg0: i32, %arg1: i32, %arg2: memref<8x256xf32, #tpu.memory_space<vmem>>, %arg3: memref<256x128xf32, #tpu.memory_space<vmem>>, %arg4: memref<1x128xf32, #tpu.memory_space<vmem>>, %arg5: memref<8x128xf32, #tpu.memory_space<vmem>>) attributes {dimension_semantics = [#tpu.dimension_semantics<parallel>, #tpu.dimension_semantics<parallel>], iteration_bounds = array<i64: 1, 1>, scalar_prefetch = 0 : i64, scratch_operands = 0 : i64, tpu.core_type = #tpu.core_type<tc>, window_params = [{pipeline_mode = #tpu.pipeline_mode<synchronous>, transform_indices = @transform_0, window_bounds = array<i64: 8, 256>}, {pipeline_mode = #tpu.pipeline_mode<synchronous>, transform_indices = @transform_1, window_bounds = array<i64: 256, 128>}, {pipeline_mode = #tpu.pipeline_mode<synchronous>, transform_indices = @transform_2, window_bounds = array<i64: 1, 128>}, {transform_indices = @transform_3, window_bounds = array<i64: 8, 128>}]} {
    %c0 = arith.constant 0 : index
    %c0_0 = arith.constant 0 : index
    %0 = vector.load %arg2[%c0, %c0_0] : memref<8x256xf32, #tpu.memory_space<vmem>>, vector<8x256xf32>
    %c0_1 = arith.constant 0 : index
    %c0_2 = arith.constant 0 : index
    %1 = vector.load %arg3[%c0_1, %c0_2] : memref<256x128xf32, #tpu.memory_space<vmem>>, vector<256x128xf32>
    %cst = arith.constant dense<0.000000e+00> : vector<8x128xf32>
    %2 = tpu.matmul %0, %1, %cst {dimension_numbers = #tpu.dot_dimension_numbers<[1], [0], [0], [1], [0, 0, 1, 1], [], []>} : vector<8x256xf32>, vector<256x128xf32>, vector<8x128xf32> -> vector<8x128xf32>
    %c0_3 = arith.constant 0 : index
    %c0_4 = arith.constant 0 : index
    %3 = vector.load %arg4[%c0_3, %c0_4] : memref<1x128xf32, #tpu.memory_space<vmem>>, vector<1x128xf32>
    %4 = vector.broadcast %3 : vector<1x128xf32> to vector<8x128xf32>
    %5 = arith.addf %2, %4 : vector<8x128xf32>
    %c0_5 = arith.constant 0 : index
    %c0_6 = arith.constant 0 : index
    %6 = vector.load %arg5[%c0_5, %c0_6] : memref<8x128xf32, #tpu.memory_space<vmem>>, vector<8x128xf32>
    tpu.vector_store %arg5[%c0_5, %c0_6], %5 {strides = array<i32>} : memref<8x128xf32, #tpu.memory_space<vmem>>, vector<8x128xf32>,
    return
  }
  func.func @transform_0(%arg0: i32, %arg1: i32) -> (i32, i32) {
    %c0_i32 = arith.constant 0 : i32
    %c0_i32_0 = arith.constant 0 : i32
    return %arg0, %c0_i32 : i32, i32
  }
  func.func @transform_1(%arg0: i32, %arg1: i32) -> (i32, i32) {
    %c0_i32 = arith.constant 0 : i32
    %c0_i32_0 = arith.constant 0 : i32
    return %c0_i32, %arg1 : i32, i32
  }
  func.func @transform_2(%arg0: i32, %arg1: i32) -> (i32, i32) {
    %c0_i32 = arith.constant 0 : i32
    %c0_i32_0 = arith.constant 0 : i32
    return %c0_i32, %arg1 : i32, i32
  }
  func.func @transform_3(%arg0: i32, %arg1: i32) -> (i32, i32) {
    %c0_i32 = arith.constant 0 : i32
    return %arg0, %arg1 : i32, i32
  }
}

module attributes {stable_mosaic.version = 11 : i64} {
  func.func @_head_kernel_resident(%arg0: i32, %arg1: i32, %arg2: memref<8x256xf32, #tpu.memory_space<vmem>>, %arg3: memref<256x128xf32, #tpu.memory_space<vmem>>, %arg4: memref<1x128xf32, #tpu.memory_space<vmem>>, %arg5: memref<8x128xf32, #tpu.memory_space<vmem>>) attributes {dimension_semantics = [#tpu.dimension_semantics<parallel>, #tpu.dimension_semantics<parallel>], iteration_bounds = array<i64: 1, 1>, scalar_prefetch = 0 : i64, scratch_operands = 0 : i64, tpu.core_type = #tpu.core_type<tc>, window_params = [{transform_indices = @transform_0, window_bounds = array<i64: 8, 256>}, {transform_indices = @transform_1, window_bounds = array<i64: 256, 128>}, {transform_indices = @transform_2, window_bounds = array<i64: 1, 128>}, {transform_indices = @transform_3, window_bounds = array<i64: 8, 128>}]} {
    %c0 = arith.constant 0 : index
    %c0_0 = arith.constant 0 : index
    %0 = vector.load %arg2[%c0, %c0_0] : memref<8x256xf32, #tpu.memory_space<vmem>>, vector<8x256xf32>
    %c0_1 = arith.constant 0 : index
    %c0_2 = arith.constant 0 : index
    %1 = vector.load %arg3[%c0_1, %c0_2] : memref<256x128xf32, #tpu.memory_space<vmem>>, vector<256x128xf32>
    %cst = arith.constant dense<0.000000e+00> : vector<8x128xf32>
    %2 = tpu.matmul %0, %1, %cst {dimension_numbers = #tpu.dot_dimension_numbers<[1], [0], [0], [1], [0, 0, 1, 1], [], []>} : vector<8x256xf32>, vector<256x128xf32>, vector<8x128xf32> -> vector<8x128xf32>
    %c0_3 = arith.constant 0 : index
    %c0_4 = arith.constant 0 : index
    %3 = vector.load %arg4[%c0_3, %c0_4] : memref<1x128xf32, #tpu.memory_space<vmem>>, vector<1x128xf32>
    %4 = vector.broadcast %3 : vector<1x128xf32> to vector<8x128xf32>
    %5 = arith.addf %2, %4 : vector<8x128xf32>
    %c0_5 = arith.constant 0 : index
    %c0_6 = arith.constant 0 : index
    %6 = vector.load %arg5[%c0_5, %c0_6] : memref<8x128xf32, #tpu.memory_space<vmem>>, vector<8x128xf32>
    tpu.vector_store %arg5[%c0_5, %c0_6], %5 {strides = array<i32>} : memref<8x128xf32, #tpu.memory_space<vmem>>, vector<8x128xf32>,
    return
  }
  func.func @transform_0(%arg0: i32, %arg1: i32) -> (i32, i32) {
    %c0_i32 = arith.constant 0 : i32
    %c0_i32_0 = arith.constant 0 : i32
    return %arg0, %c0_i32 : i32, i32
  }
  func.func @transform_1(%arg0: i32, %arg1: i32) -> (i32, i32) {
    %c0_i32 = arith.constant 0 : i32
    %c0_i32_0 = arith.constant 0 : i32
    return %c0_i32, %arg1 : i32, i32
  }
  func.func @transform_2(%arg0: i32, %arg1: i32) -> (i32, i32) {
    %c0_i32 = arith.constant 0 : i32
    %c0_i32_0 = arith.constant 0 : i32
    return %c0_i32, %arg1 : i32, i32
  }
  func.func @transform_3(%arg0: i32, %arg1: i32) -> (i32, i32) {
    %c0_i32 = arith.constant 0 : i32
    return %arg0, %arg1 : i32, i32
  }
}

</mosaic_0001>

<bundles_post_ra>
// kernel: tpu_custom_call.1
= control target key start
LH: loop header
LB: loop body
LE: loop exit
PB: predicated region body
PF: predicated region fallthrough
CT: control target
= control target key end

     0   :  { %8 = vsyncpa [#allocation3], 0  ;;  %s385_s0 = inlined_call_operand.hbm [shape: f32[8,256], index: 0, kind: input, shape index: {}]   ;;  %s386_s1 = inlined_call_operand.hbm [shape: f32[256,128], index: 1, kind: input, shape index: {}]   ;;  %s387_s2 = inlined_call_operand.vmem [shape: f32[1,128], index: 2, kind: input, shape index: {}]   ;;  %s388_s3 = inlined_call_operand.hbm [shape: f32[8,128], index: 3, kind: output, shape index: {}]  }
   0x1   :  { %9 = vsyncpa [#allocation6], 0 }
   0x2   :  { %10 = vsyncpa [#allocation4], 0  ;;  %s314_s12 = smov [#allocation2]   ;;  %s315_s14 = smov [#allocation5]  }
   0x3   :  { %s17_s13 = sshll.u32 %s314_s12, 4  ;;  %s26_s15 = sshll.u32 %s315_s14, 4  ;;  %s18_s13 = int_to_ptr.vmem [resolvable:$true] %s17_s13  ;;  %s339_s15 = int_to_ptr.vmem [resolvable:$true] %s26_s15 }
   0x4   :  { %s242_s18 = scalar_lea.hbm %s385_s0, 256 }
   0x5   :  { %p243_p0 = scmp.ne.s32.totalorder %s385_s0, %s242_s18  ;;  %p246_p1 = scmp.lt.u32.totalorder %s242_s18, %s385_s0 }
   0x7   :  { %p248_p2 = pnand %p246_p1, %p243_p0 }
   0x9   :  { %251 = shalt.err (!%p248_p2)
}
   0xa   :  { %s252_s23 = scalar_lea.vmem %s18_s13, 256  ;;  %p257_p4 = scmp.lt.s32.totalorder %s18_s13, %s18_s13 }
   0xb   :  { %p253_p3 = scmp.ne.s32.totalorder %s18_s13, %s252_s23  ;;  %p258_p5 = scmp.lt.s32.totalorder %s252_s23, %s252_s23 }
   0xd   :  { %p259_p6 = por %p258_p5, %p257_p4 }
   0xf   :  { %p260_p7 = pnand %p259_p6, %p253_p3 }
  0x11   :  { %263 = shalt.err (!%p260_p7)
}
  0x12   :  { %20 = dma.hbm_to_vmem [thread:$0]  %s385_s0, 256, %s18_s13, [#allocation3]  }
  0x13   :  { %s264_s28 = scalar_lea.hbm %s386_s1, 4096 }
  0x14   :  { %p265_p8 = scmp.ne.s32.totalorder %s386_s1, %s264_s28  ;;  %p268_p9 = scmp.lt.u32.totalorder %s264_s28, %s386_s1 }
  0x16   :  { %p270_p10 = pnand %p268_p9, %p265_p8 }
  0x18   :  { %273 = shalt.err (!%p270_p10)
}
  0x19   :  { %s274_s6 = scalar_lea.vmem %s339_s15, 4096  ;;  %p279_p12 = scmp.lt.s32.totalorder %s339_s15, %s339_s15 }
  0x1a   :  { %p275_p11 = scmp.ne.s32.totalorder %s339_s15, %s274_s6  ;;  %p280_p13 = scmp.lt.s32.totalorder %s274_s6, %s274_s6 }
  0x1c   :  { %p281_p0 = por %p280_p13, %p279_p12 }
  0x1e   :  { %p282_p1 = pnand %p281_p0, %p275_p11 }
  0x20   :  { %285 = shalt.err (!%p282_p1)
}
  0x21   :  { %s316_s0 = smov 128   ;;  %s317_s7 = smov 8  }
  0x22   :  { %32 = dma.hbm_to_vmem [thread:$0]  %s386_s1, 4096, %s339_s15, [#allocation6], %s316_s0, %s316_s0, %s317_s7  }
  0x23   :  { %308 = dma.done.wait [#allocation3], 256  }
  0x24   :  { %309 = vsyncadd [#allocation3], 4294967040 }
  0x25   :  { %310 = dma.done.wait [#allocation6], 4096  }
  0x26   :  { %311 = vsyncadd [#allocation6], 4294963200  ;;  %v59_v0 = vld [vmem:[#allocation5 + $0x80] sm:$0xff]  ;;  %v60_v1 = vld [vmem:[#allocation5 + $0x88] sm:$0xff]  ;;  %s318_s11 = smov [#allocation7]  }
  0x27   :  { %v43_v2 = vld [vmem:[#allocation5] sm:$0xff]  ;;  %v205_v3 = vpack.c.bf16 %v60_v1, %v59_v0  ;;  %v44_v4 = vld [vmem:[#allocation5 + $0x8] sm:$0xff]  ;;  %v61_v5 = vld [vmem:[#allocation5 + $0x90] sm:$0xff]  ;;  %s159_s12 = sshll.u32 %s318_s11, 4  ;;  %s160_s12 = int_to_ptr.vmem [resolvable:$true] %s159_s12 }
  0x28   :  { %v62_v6 = vld [vmem:[#allocation5 + $0x98] sm:$0xff]  ;;  %v207_v7 = vpack.c.bf16 %v44_v4, %v43_v2  ;;  %v45_v9 = vld [vmem:[#allocation5 + $0x10] sm:$0xff]  ;;  %v63_v11 = vld [vmem:[#allocation5 + $0xa0] sm:$0xff]  ;;  %s286_s13 = scalar_lea.vmem %s160_s12, 128  ;;  %p291_p3 = scmp.lt.s32.totalorder %s160_s12, %s160_s12 }
  0x29   :  { %v209_v8 = vpack.c.bf16 %v62_v6, %v61_v5  ;;  %v46_v10 = vld [vmem:[#allocation5 + $0x18] sm:$0xff]  ;;  %206 = vmatprep.subr.bf16.mxu0 %v205_v3  ;;  %v64_v12 = vld [vmem:[#allocation5 + $0xa8] sm:$0xff]  ;;  %v47_v15 = vld [vmem:[#allocation5 + $0x20] sm:$0xff]  ;;  %p287_p2 = scmp.ne.s32.totalorder %s160_s12, %s286_s13  ;;  %p292_p4 = scmp.lt.s32.totalorder %s286_s13, %s286_s13 }
  0x2a   :  { %208 = vmatpush3.bf16.msra.mxu0 %v207_v7  ;;  %v211_v13 = vpack.c.bf16 %v46_v10, %v45_v9  ;;  %v213_v14 = vpack.c.bf16 %v64_v12, %v63_v11  ;;  %v48_v16 = vld [vmem:[#allocation5 + $0x28] sm:$0xff]  ;;  %v65_v17 = vld [vmem:[#allocation5 + $0xb0] sm:$0xff]  ;;  %v66_v18 = vld [vmem:[#allocation5 + $0xb8] sm:$0xff] }
  0x2b   :  { %210 = vmatprep.subr.bf16.mxu0 %v209_v8  ;;  %v215_v19 = vpack.c.bf16 %v48_v16, %v47_v15  ;;  %v217_v20 = vpack.c.bf16 %v66_v18, %v65_v17  ;;  %v49_v21 = vld [vmem:[#allocation5 + $0x30] sm:$0xff]  ;;  %v50_v22 = vld [vmem:[#allocation5 + $0x38] sm:$0xff]  ;;  %v67_v23 = vld [vmem:[#allocation5 + $0xc0] sm:$0xff]  ;;  %p293_p5 = por %p292_p4, %p291_p3 }
  0x2c   :  { %v68_v24 = vld [vmem:[#allocation5 + $0xc8] sm:$0xff]  ;;  %v42_v25 = vld [vmem:[#allocation2 + $0x8] sm:$0xff]  ;;  %v219_v26 = vpack.c.bf16 %v50_v22, %v49_v21  ;;  %v51_v28 = vld [vmem:[#allocation5 + $0x40] sm:$0xff] }
  0x2d   :  { %146 = vmatprep.mubr.f32.mxu0 %v42_v25  ;;  %v221_v27 = vpack.c.bf16 %v68_v24, %v67_v23  ;;  %v52_v29 = vld [vmem:[#allocation5 + $0x48] sm:$0xff]  ;;  %v69_v30 = vld [vmem:[#allocation5 + $0xd0] sm:$0xff]  ;;  %v70_v31 = vld [vmem:[#allocation5 + $0xd8] sm:$0xff]  ;;  %p294_p6 = pnand %p293_p5, %p287_p2 }
  0x2e   :  { %212 = vmatpush3.bf16.msra.mxu0 %v211_v13  ;;  %v223_v32 = vpack.c.bf16 %v52_v29, %v51_v28  ;;  %v225_v33 = vpack.c.bf16 %v70_v31, %v69_v30  ;;  %v53_v34 = vld [vmem:[#allocation5 + $0x50] sm:$0xff]  ;;  %v54_v35 = vld [vmem:[#allocation5 + $0x58] sm:$0xff]  ;;  %v71_v36 = vld [vmem:[#allocation5 + $0xe0] sm:$0xff] }
  0x2f   :  { %214 = vmatprep.subr.bf16.mxu0 %v213_v14  ;;  %v72_v37 = vld [vmem:[#allocation5 + $0xe8] sm:$0xff]  ;;  %v227_v38 = vpack.c.bf16 %v54_v35, %v53_v34  ;;  %v55_v40 = vld [vmem:[#allocation5 + $0x60] sm:$0xff]  ;;  %v73_v42 = vld [vmem:[#allocation5 + $0xf0] sm:$0xff] }
  0x30   :  { %v229_v39 = vpack.c.bf16 %v72_v37, %v71_v36  ;;  %v56_v41 = vld [vmem:[#allocation5 + $0x68] sm:$0xff]  ;;  %v74_v43 = vld [vmem:[#allocation5 + $0xf8] sm:$0xff]  ;;  %v57_v46 = vld [vmem:[#allocation5 + $0x70] sm:$0xff] }
  0x31   :  { %v231_v44 = vpack.c.bf16 %v56_v41, %v55_v40  ;;  %v233_v45 = vpack.c.bf16 %v74_v43, %v73_v42  ;;  %v58_v47 = vld [vmem:[#allocation5 + $0x78] sm:$0xff]  ;;  %v41_v49 = vld [vmem:[#allocation2] sm:$0xff] }
  0x32   :  { %216 = vmatpush3.bf16.msra.mxu0 %v215_v19  ;;  %v235_v48 = vpack.c.bf16 %v58_v47, %v57_v46  ;;  %v169_v51 = vld [vmem:[%s387_s2] ss:$0 sm:$0xff] }
  0x33   :  { %218 = vmatprep.subr.bf16.mxu0 %v217_v20 }
  0x36   :  { %220 = vmatpush3.bf16.msra.mxu0 %v219_v26 }
  0x37   :  { %222 = vmatprep.subr.bf16.mxu0 %v221_v27 }
  0x3a   :  { %224 = vmatpush3.bf16.msra.mxu0 %v223_v32 }
  0x3b   :  { %226 = vmatprep.subr.bf16.mxu0 %v225_v33 }
  0x3e   :  { %228 = vmatpush3.bf16.msra.mxu0 %v227_v38 }
  0x3f   :  { %230 = vmatprep.subr.bf16.mxu0 %v229_v39 }
  0x42   :  { %232 = vmatpush3.bf16.msra.mxu0 %v231_v44 }
  0x43   :  { %234 = vmatprep.subr.bf16.mxu0 %v233_v45 }
  0x46   :  { %236 = vmatpush3.bf16.msra.mxu0 %v235_v48 }
  0x49   :  { %147 = vmatmul.mubr.f32.vlgmr.msra.gmra.mrb[0].mxu0 %v41_v49 }
 0x11c   :  { %v202_v50 = vpop.f32.mrb[0].mxu0 }
 0x11d   :  { %v203_v52 = vpop.f32.mrb[1].mxu0 }
 0x11e   :  { %v204_v53 = vadd.f32 %v203_v52, %v202_v50 }
 0x120   :  { %v149_v54 = vadd.f32 %v204_v53, %v169_v51 }
 0x122   :  { %152 = vst [vmem:[#allocation7] sm:$0xff] %v149_v54 }
 0x123   :  { %297 = shalt.err (!%p294_p6)
}
 0x124   :  { %s298_s16 = scalar_lea.hbm %s388_s3, 128 }
 0x125   :  { %p299_p7 = scmp.ne.s32.totalorder %s388_s3, %s298_s16  ;;  %p302_p8 = scmp.lt.u32.totalorder %s298_s16, %s388_s3 }
 0x127   :  { %p304_p9 = pnand %p302_p8, %p299_p7 }
 0x129   :  { %307 = shalt.err (!%p304_p9)
}
 0x12a   :  { %162 = dma.vmem_to_hbm [thread:$0]  %s160_s12, 128, %s388_s3, [#allocation4]  }
 0x12b   :  { %312 = dma.done.wait [#allocation4], 128  }
 0x12c   :  { %313 = vsyncadd [#allocation4], 4294967168 }
 0x12d   :  { %166 = vsyncpa [#allocation3], 1 }
 0x12e   :  { %167 = vsyncpa [#allocation6], 1 }
 0x12f   :  { %168 = vsyncpa [#allocation4], 1 }

// kernel: tpu_custom_call.1
= control target key start
LH: loop header
LB: loop body
LE: loop exit
PB: predicated region body
PF: predicated region fallthrough
CT: control target
= control target key end

     0   :  { %8 = vsyncpa [#allocation3], 0  ;;  %s385_s0 = inlined_call_operand.hbm [shape: f32[8,256], index: 0, kind: input, shape index: {}]   ;;  %s386_s1 = inlined_call_operand.hbm [shape: f32[256,128], index: 1, kind: input, shape index: {}]   ;;  %s387_s2 = inlined_call_operand.vmem [shape: f32[1,128], index: 2, kind: input, shape index: {}]   ;;  %s388_s3 = inlined_call_operand.hbm [shape: f32[8,128], index: 3, kind: output, shape index: {}]  }
   0x1   :  { %9 = vsyncpa [#allocation6], 0 }
   0x2   :  { %10 = vsyncpa [#allocation4], 0  ;;  %s314_s12 = smov [#allocation2]   ;;  %s315_s14 = smov [#allocation5]  }
   0x3   :  { %s17_s13 = sshll.u32 %s314_s12, 4  ;;  %s26_s15 = sshll.u32 %s315_s14, 4  ;;  %s18_s13 = int_to_ptr.vmem [resolvable:$true] %s17_s13  ;;  %s339_s15 = int_to_ptr.vmem [resolvable:$true] %s26_s15 }
   0x4   :  { %s242_s18 = scalar_lea.hbm %s385_s0, 256 }
   0x5   :  { %p243_p0 = scmp.ne.s32.totalorder %s385_s0, %s242_s18  ;;  %p246_p1 = scmp.lt.u32.totalorder %s242_s18, %s385_s0 }
   0x7   :  { %p248_p2 = pnand %p246_p1, %p243_p0 }
   0x9   :  { %251 = shalt.err (!%p248_p2)
}
   0xa   :  { %s252_s23 = scalar_lea.vmem %s18_s13, 256  ;;  %p257_p4 = scmp.lt.s32.totalorder %s18_s13, %s18_s13 }
   0xb   :  { %p253_p3 = scmp.ne.s32.totalorder %s18_s13, %s252_s23  ;;  %p258_p5 = scmp.lt.s32.totalorder %s252_s23, %s252_s23 }
   0xd   :  { %p259_p6 = por %p258_p5, %p257_p4 }
   0xf   :  { %p260_p7 = pnand %p259_p6, %p253_p3 }
  0x11   :  { %263 = shalt.err (!%p260_p7)
}
  0x12   :  { %20 = dma.hbm_to_vmem [thread:$0]  %s385_s0, 256, %s18_s13, [#allocation3]  }
  0x13   :  { %s264_s28 = scalar_lea.hbm %s386_s1, 4096 }
  0x14   :  { %p265_p8 = scmp.ne.s32.totalorder %s386_s1, %s264_s28  ;;  %p268_p9 = scmp.lt.u32.totalorder %s264_s28, %s386_s1 }
  0x16   :  { %p270_p10 = pnand %p268_p9, %p265_p8 }
  0x18   :  { %273 = shalt.err (!%p270_p10)
}
  0x19   :  { %s274_s6 = scalar_lea.vmem %s339_s15, 4096  ;;  %p279_p12 = scmp.lt.s32.totalorder %s339_s15, %s339_s15 }
  0x1a   :  { %p275_p11 = scmp.ne.s32.totalorder %s339_s15, %s274_s6  ;;  %p280_p13 = scmp.lt.s32.totalorder %s274_s6, %s274_s6 }
  0x1c   :  { %p281_p0 = por %p280_p13, %p279_p12 }
  0x1e   :  { %p282_p1 = pnand %p281_p0, %p275_p11 }
  0x20   :  { %285 = shalt.err (!%p282_p1)
}
  0x21   :  { %s316_s0 = smov 128   ;;  %s317_s7 = smov 8  }
  0x22   :  { %32 = dma.hbm_to_vmem [thread:$0]  %s386_s1, 4096, %s339_s15, [#allocation6], %s316_s0, %s316_s0, %s317_s7  }
  0x23   :  { %308 = dma.done.wait [#allocation3], 256  }
  0x24   :  { %309 = vsyncadd [#allocation3], 4294967040 }
  0x25   :  { %310 = dma.done.wait [#allocation6], 4096  }
  0x26   :  { %311 = vsyncadd [#allocation6], 4294963200  ;;  %v59_v0 = vld [vmem:[#allocation5 + $0x80] sm:$0xff]  ;;  %v60_v1 = vld [vmem:[#allocation5 + $0x88] sm:$0xff]  ;;  %s318_s11 = smov [#allocation7]  }
  0x27   :  { %v43_v2 = vld [vmem:[#allocation5] sm:$0xff]  ;;  %v205_v3 = vpack.c.bf16 %v60_v1, %v59_v0  ;;  %v44_v4 = vld [vmem:[#allocation5 + $0x8] sm:$0xff]  ;;  %v61_v5 = vld [vmem:[#allocation5 + $0x90] sm:$0xff]  ;;  %s159_s12 = sshll.u32 %s318_s11, 4  ;;  %s160_s12 = int_to_ptr.vmem [resolvable:$true] %s159_s12 }
  0x28   :  { %v62_v6 = vld [vmem:[#allocation5 + $0x98] sm:$0xff]  ;;  %v207_v7 = vpack.c.bf16 %v44_v4, %v43_v2  ;;  %v45_v9 = vld [vmem:[#allocation5 + $0x10] sm:$0xff]  ;;  %v63_v11 = vld [vmem:[#allocation5 + $0xa0] sm:$0xff]  ;;  %s286_s13 = scalar_lea.vmem %s160_s12, 128  ;;  %p291_p3 = scmp.lt.s32.totalorder %s160_s12, %s160_s12 }
  0x29   :  { %v209_v8 = vpack.c.bf16 %v62_v6, %v61_v5  ;;  %v46_v10 = vld [vmem:[#allocation5 + $0x18] sm:$0xff]  ;;  %206 = vmatprep.subr.bf16.mxu0 %v205_v3  ;;  %v64_v12 = vld [vmem:[#allocation5 + $0xa8] sm:$0xff]  ;;  %v47_v15 = vld [vmem:[#allocation5 + $0x20] sm:$0xff]  ;;  %p287_p2 = scmp.ne.s32.totalorder %s160_s12, %s286_s13  ;;  %p292_p4 = scmp.lt.s32.totalorder %s286_s13, %s286_s13 }
  0x2a   :  { %208 = vmatpush3.bf16.msra.mxu0 %v207_v7  ;;  %v211_v13 = vpack.c.bf16 %v46_v10, %v45_v9  ;;  %v213_v14 = vpack.c.bf16 %v64_v12, %v63_v11  ;;  %v48_v16 = vld [vmem:[#allocation5 + $0x28] sm:$0xff]  ;;  %v65_v17 = vld [vmem:[#allocation5 + $0xb0] sm:$0xff]  ;;  %v66_v18 = vld [vmem:[#allocation5 + $0xb8] sm:$0xff] }
  0x2b   :  { %210 = vmatprep.subr.bf16.mxu0 %v209_v8  ;;  %v215_v19 = vpack.c.bf16 %v48_v16, %v47_v15  ;;  %v217_v20 = vpack.c.bf16 %v66_v18, %v65_v17  ;;  %v49_v21 = vld [vmem:[#allocation5 + $0x30] sm:$0xff]  ;;  %v50_v22 = vld [vmem:[#allocation5 + $0x38] sm:$0xff]  ;;  %v67_v23 = vld [vmem:[#allocation5 + $0xc0] sm:$0xff]  ;;  %p293_p5 = por %p292_p4, %p291_p3 }
  0x2c   :  { %v68_v24 = vld [vmem:[#allocation5 + $0xc8] sm:$0xff]  ;;  %v42_v25 = vld [vmem:[#allocation2 + $0x8] sm:$0xff]  ;;  %v219_v26 = vpack.c.bf16 %v50_v22, %v49_v21  ;;  %v51_v28 = vld [vmem:[#allocation5 + $0x40] sm:$0xff] }
  0x2d   :  { %146 = vmatprep.mubr.f32.mxu0 %v42_v25  ;;  %v221_v27 = vpack.c.bf16 %v68_v24, %v67_v23  ;;  %v52_v29 = vld [vmem:[#allocation5 + $0x48] sm:$0xff]  ;;  %v69_v30 = vld [vmem:[#allocation5 + $0xd0] sm:$0xff]  ;;  %v70_v31 = vld [vmem:[#allocation5 + $0xd8] sm:$0xff]  ;;  %p294_p6 = pnand %p293_p5, %p287_p2 }
  0x2e   :  { %212 = vmatpush3.bf16.msra.mxu0 %v211_v13  ;;  %v223_v32 = vpack.c.bf16 %v52_v29, %v51_v28  ;;  %v225_v33 = vpack.c.bf16 %v70_v31, %v69_v30  ;;  %v53_v34 = vld [vmem:[#allocation5 + $0x50] sm:$0xff]  ;;  %v54_v35 = vld [vmem:[#allocation5 + $0x58] sm:$0xff]  ;;  %v71_v36 = vld [vmem:[#allocation5 + $0xe0] sm:$0xff] }
  0x2f   :  { %214 = vmatprep.subr.bf16.mxu0 %v213_v14  ;;  %v72_v37 = vld [vmem:[#allocation5 + $0xe8] sm:$0xff]  ;;  %v227_v38 = vpack.c.bf16 %v54_v35, %v53_v34  ;;  %v55_v40 = vld [vmem:[#allocation5 + $0x60] sm:$0xff]  ;;  %v73_v42 = vld [vmem:[#allocation5 + $0xf0] sm:$0xff] }
  0x30   :  { %v229_v39 = vpack.c.bf16 %v72_v37, %v71_v36  ;;  %v56_v41 = vld [vmem:[#allocation5 + $0x68] sm:$0xff]  ;;  %v74_v43 = vld [vmem:[#allocation5 + $0xf8] sm:$0xff]  ;;  %v57_v46 = vld [vmem:[#allocation5 + $0x70] sm:$0xff] }
  0x31   :  { %v231_v44 = vpack.c.bf16 %v56_v41, %v55_v40  ;;  %v233_v45 = vpack.c.bf16 %v74_v43, %v73_v42  ;;  %v58_v47 = vld [vmem:[#allocation5 + $0x78] sm:$0xff]  ;;  %v41_v49 = vld [vmem:[#allocation2] sm:$0xff] }
  0x32   :  { %216 = vmatpush3.bf16.msra.mxu0 %v215_v19  ;;  %v235_v48 = vpack.c.bf16 %v58_v47, %v57_v46  ;;  %v169_v51 = vld [vmem:[%s387_s2] ss:$0 sm:$0xff] }
  0x33   :  { %218 = vmatprep.subr.bf16.mxu0 %v217_v20 }
  0x36   :  { %220 = vmatpush3.bf16.msra.mxu0 %v219_v26 }
  0x37   :  { %222 = vmatprep.subr.bf16.mxu0 %v221_v27 }
  0x3a   :  { %224 = vmatpush3.bf16.msra.mxu0 %v223_v32 }
  0x3b   :  { %226 = vmatprep.subr.bf16.mxu0 %v225_v33 }
  0x3e   :  { %228 = vmatpush3.bf16.msra.mxu0 %v227_v38 }
  0x3f   :  { %230 = vmatprep.subr.bf16.mxu0 %v229_v39 }
  0x42   :  { %232 = vmatpush3.bf16.msra.mxu0 %v231_v44 }
  0x43   :  { %234 = vmatprep.subr.bf16.mxu0 %v233_v45 }
  0x46   :  { %236 = vmatpush3.bf16.msra.mxu0 %v235_v48 }
  0x49   :  { %147 = vmatmul.mubr.f32.vlgmr.msra.gmra.mrb[0].mxu0 %v41_v49 }
 0x11c   :  { %v202_v50 = vpop.f32.mrb[0].mxu0 }
 0x11d   :  { %v203_v52 = vpop.f32.mrb[1].mxu0 }
 0x11e   :  { %v204_v53 = vadd.f32 %v203_v52, %v202_v50 }
 0x120   :  { %v149_v54 = vadd.f32 %v204_v53, %v169_v51 }
 0x122   :  { %152 = vst [vmem:[#allocation7] sm:$0xff] %v149_v54 }
 0x123   :  { %297 = shalt.err (!%p294_p6)
}
 0x124   :  { %s298_s16 = scalar_lea.hbm %s388_s3, 128 }
 0x125   :  { %p299_p7 = scmp.ne.s32.totalorder %s388_s3, %s298_s16  ;;  %p302_p8 = scmp.lt.u32.totalorder %s298_s16, %s388_s3 }
 0x127   :  { %p304_p9 = pnand %p302_p8, %p299_p7 }
 0x129   :  { %307 = shalt.err (!%p304_p9)
}
 0x12a   :  { %162 = dma.vmem_to_hbm [thread:$0]  %s160_s12, 128, %s388_s3, [#allocation4]  }
 0x12b   :  { %312 = dma.done.wait [#allocation4], 128  }
 0x12c   :  { %313 = vsyncadd [#allocation4], 4294967168 }
 0x12d   :  { %166 = vsyncpa [#allocation3], 1 }
 0x12e   :  { %167 = vsyncpa [#allocation6], 1 }
 0x12f   :  { %168 = vsyncpa [#allocation4], 1 }

</bundles_post_ra>
